<compile_context>
chip_gen: v6e
topology: v6e:2x2x1
jax: 0.10.0
libtpu: 0.0.40
codegen_flags: <defaults>
</compile_context>

<pallas_src>
import functools

import jax
import jax.numpy as jnp
from jax.experimental import pallas as pl
from jax.experimental.pallas import tpu as pltpu


def _round_up(x, m):
    return ((x + m - 1) // m) * m


# Rows per in-kernel sub-chunk; lets the EUP tanh of one chunk hide under the
# MXU work of the next chunk.
_ROW_CHUNK = 512


def _mlp_kernel(z_ref, w_in_ref, b_in_ref, w_h_ref, b_h_ref, w_out_ref, b_out_ref,
                o_ref, *, num_hidden_layers, row_chunk, n_chunks):
    mm_dtype = w_in_ref.dtype  # matmul operand dtype (f32 or bf16); acc stays f32

    def do_chunk(r0):
        z = z_ref[pl.ds(r0, row_chunk), :].astype(mm_dtype)
        # linear_in + relu
        h = jnp.dot(z, w_in_ref[...], preferred_element_type=jnp.float32)
        h = jnp.maximum(h + b_in_ref[...], 0.0)
        # hidden linears + relu (static, small trip count -> unrolled python loop)
        for l in range(num_hidden_layers - 1):
            h = jnp.dot(h.astype(mm_dtype), w_h_ref[l],
                        preferred_element_type=jnp.float32)
            h = jnp.maximum(h + b_h_ref[l], 0.0)
        # linear_out + tanh
        out = jnp.dot(h.astype(mm_dtype), w_out_ref[...],
                      preferred_element_type=jnp.float32)
        o_ref[pl.ds(r0, row_chunk), :] = jnp.tanh(out + b_out_ref[...]).astype(o_ref.dtype)

    if n_chunks == 1:
        do_chunk(0)
    else:
        def body(c, carry):
            do_chunk(pl.multiple_of(c * row_chunk, row_chunk))
            return carry
        jax.lax.fori_loop(0, n_chunks, body, 0, unroll=True)


def final_tanh_f_prime(z, params, *, hidden_channels, num_hidden_layers,
                       tile_n=4096, matmul_dtype=None, out_dtype=jnp.float32):
    """z: (..., hidden_channels) -> (..., hidden_channels, hidden_channels).

    tile_n:       rows per grid step (clamped / aligned internally).
    matmul_dtype: None (f32, exact) or jnp.bfloat16 (faster MXU, looser numerics).
    out_dtype:    output dtype (f32 default; bf16 halves writeback if tolerated).
    """
    w_in, b_in, w_h, b_h, w_out, b_out = params
    lead_shape = z.shape[:-1]
    H = hidden_channels
    HH = w_in.shape[1]
    OUT = H * H

    N = 1
    for d in lead_shape:
        N *= d
    z2 = z.reshape(N, H)

    if matmul_dtype is not None:
        w_in = w_in.astype(matmul_dtype)
        w_h = w_h.astype(matmul_dtype)
        w_out = w_out.astype(matmul_dtype)

    # Tile sizing:
    #  * tile_n is either <= _ROW_CHUNK (tiny inputs, 8-aligned) or a multiple
    #    of _ROW_CHUNK so the in-kernel chunk loop divides evenly,
    #  * keep at least 2 grid steps when there's enough work so v7x's two
    #    TensorCores both get fed,
    #  * tile_n <= 4096 keeps VMEM ~13 MiB, safe on v7x's 64 MiB part.
    if N <= _ROW_CHUNK:
        tile_n = _round_up(max(N, 1), 8)
    else:
        tile_n = _round_up(min(tile_n, _round_up(N, _ROW_CHUNK)), _ROW_CHUNK)
        if pl.cdiv(N, tile_n) < 2:
            tile_n = max(_ROW_CHUNK, _round_up(pl.cdiv(N, 2), _ROW_CHUNK))
    row_chunk = min(_ROW_CHUNK, tile_n)
    n_chunks = tile_n // row_chunk
    grid_n = pl.cdiv(N, tile_n)

    n_hid_slots = max(num_hidden_layers - 1, 1)

    kernel = functools.partial(_mlp_kernel,
                               num_hidden_layers=num_hidden_layers,
                               row_chunk=row_chunk,
                               n_chunks=n_chunks)

    out2 = pl.pallas_call(
        kernel,
        out_shape=jax.ShapeDtypeStruct((N, OUT), out_dtype),
        grid_spec=pltpu.PrefetchScalarGridSpec(
            num_scalar_prefetch=0,
            grid=(grid_n,),
            in_specs=[
                pl.BlockSpec((tile_n, H), lambda i: (i, 0)),               # z tile
                pl.BlockSpec((H, HH), lambda i: (0, 0)),                   # w_in
                pl.BlockSpec((1, HH), lambda i: (0, 0)),                   # b_in
                pl.BlockSpec((n_hid_slots, HH, HH), lambda i: (0, 0, 0)),  # stacked hidden W
                pl.BlockSpec((n_hid_slots, 1, HH), lambda i: (0, 0, 0)),   # stacked hidden b
                pl.BlockSpec((HH, OUT), lambda i: (0, 0)),                 # w_out
                pl.BlockSpec((1, OUT), lambda i: (0, 0)),                  # b_out
            ],
            out_specs=pl.BlockSpec((tile_n, OUT), lambda i: (i, 0)),
        ),
        compiler_params=pltpu.CompilerParams(
            dimension_semantics=("parallel",),
            # ~13 MiB actual footprint at tile_n=4096; 32 MiB limit is safe on
            # every generation (above v5e's 16 MiB scoped default, below v7x's
            # 64 MiB physical VMEM).
            vmem_limit_bytes=32 * 1024 * 1024,
        ),
    )(z2, w_in, b_in, w_h, b_h, w_out, b_out)

    # Contiguous reshape only -- no slice, no extra HBM copy.
    return out2.reshape(*lead_shape, H, H)


def init_params(key, hidden_channels, hidden_hidden_channels, num_hidden_layers):
    """Deterministic PyTorch-Linear-style init (uniform +/- 1/sqrt(fan_in))."""
    H, HH = hidden_channels, hidden_hidden_channels
    OUT = H * H
    n_hid = max(num_hidden_layers - 1, 1)
    ks = jax.random.split(key, 6)

    def u(k, shape, fan_in):
        bound = 1.0 / jnp.sqrt(jnp.float32(fan_in))
        return jax.random.uniform(k, shape, jnp.float32, -bound, bound)

    # Weights stored already transposed: (in, out) so kernel does z @ W.
    w_in = u(ks[0], (H, HH), H)
    b_in = u(ks[1], (1, HH), H)
    w_h = u(ks[2], (n_hid, HH, HH), HH)
    b_h = u(ks[3], (n_hid, 1, HH), HH)
    if num_hidden_layers - 1 == 0:
        # padding slot, never used by the kernel loop
        w_h = jnp.zeros((1, HH, HH), jnp.float32)
        b_h = jnp.zeros((1, 1, HH), jnp.float32)
    w_out = u(ks[4], (HH, OUT), HH)
    b_out = u(ks[5], (1, OUT), HH)
    return (w_in, b_in, w_h, b_h, w_out, b_out)


def reference(z, params, hidden_channels, num_hidden_layers):
    w_in, b_in, w_h, b_h, w_out, b_out = params
    h = jnp.maximum(z @ w_in + b_in[0], 0.0)
    for l in range(num_hidden_layers - 1):
        h = jnp.maximum(h @ w_h[l] + b_h[l, 0], 0.0)
    out = jnp.tanh(h @ w_out + b_out[0])
    return out.reshape(*z.shape[:-1], hidden_channels, hidden_channels)


if __name__ == "__main__":
    # Small shapes consistent with the module's forward.
    input_channels = 4          # unused by forward (kept for parity with __init__)
    hidden_channels = 16
    hidden_hidden_channels = 32
    num_hidden_layers = 3
    batch, seq = 2, 8           # leading dims of z  (N = 16)

    key = jax.random.PRNGKey(0)
    kz, kp = jax.random.split(key)
    z = jax.random.normal(kz, (batch, seq, hidden_channels), jnp.float32)
    params = init_params(kp, hidden_channels, hidden_hidden_channels, num_hidden_layers)

    out = final_tanh_f_prime(z, params,
                             hidden_channels=hidden_channels,
                             num_hidden_layers=num_hidden_layers)
    out = jax.block_until_ready(out)

    ref = reference(z, params, hidden_channels, num_hidden_layers)
    assert out.shape == (batch, seq, hidden_channels, hidden_channels), out.shape
    assert jnp.allclose(out, ref, atol=1e-5, rtol=1e-5), "mismatch vs reference"

    # Larger, non-divisible N: exercises the ragged last block (no host pad/slice),
    # the grid_n >= 2 split, and the in-kernel row-chunk loop.
    z_big = jax.random.normal(kz, (3, 345, hidden_channels), jnp.float32)
    out_big = jax.block_until_ready(
        final_tanh_f_prime(z_big, params,
                           hidden_channels=hidden_channels,
                           num_hidden_layers=num_hidden_layers))
    ref_big = reference(z_big, params, hidden_channels, num_hidden_layers)
    assert jnp.allclose(out_big, ref_big, atol=1e-5, rtol=1e-5), "mismatch (big) vs reference"

    # Optional fast path: bf16 matmul operands with f32 accumulation (v6e/v7x
    # MXU win).  Numerics are looser; tanh-bounded outputs stay within ~5e-2.
    out_bf16 = jax.block_until_ready(
        final_tanh_f_prime(z_big, params,
                           hidden_channels=hidden_channels,
                           num_hidden_layers=num_hidden_layers,
                           matmul_dtype=jnp.bfloat16))
    assert jnp.allclose(out_bf16, ref_big, atol=5e-2, rtol=0.0), "mismatch (bf16) vs reference"

    print("KERNEL_OK")
</pallas_src>

<mosaic_0001>
module attributes {stable_mosaic.version = 11 : i64} {
  func.func @_mlp_kernel(%arg0: i32, %arg1: memref<16x16xf32, #tpu.memory_space<vmem>>, %arg2: memref<16x32xf32, #tpu.memory_space<vmem>>, %arg3: memref<1x32xf32, #tpu.memory_space<vmem>>, %arg4: memref<2x32x32xf32, #tpu.memory_space<vmem>>, %arg5: memref<2x1x32xf32, #tpu.memory_space<vmem>>, %arg6: memref<32x256xf32, #tpu.memory_space<vmem>>, %arg7: memref<1x256xf32, #tpu.memory_space<vmem>>, %arg8: memref<16x256xf32, #tpu.memory_space<vmem>>) attributes {dimension_semantics = [#tpu.dimension_semantics<parallel>], iteration_bounds = array<i64: 1>, scalar_prefetch = 0 : i64, scratch_operands = 0 : i64, tpu.core_type = #tpu.core_type<tc>, window_params = [{transform_indices = @transform_0, window_bounds = array<i64: 16, 16>}, {pipeline_mode = #tpu.pipeline_mode<synchronous>, transform_indices = @transform_1, window_bounds = array<i64: 16, 32>}, {pipeline_mode = #tpu.pipeline_mode<synchronous>, transform_indices = @transform_2, window_bounds = array<i64: 1, 32>}, {pipeline_mode = #tpu.pipeline_mode<synchronous>, transform_indices = @transform_3, window_bounds = array<i64: 2, 32, 32>}, {pipeline_mode = #tpu.pipeline_mode<synchronous>, transform_indices = @transform_4, window_bounds = array<i64: 2, 1, 32>}, {pipeline_mode = #tpu.pipeline_mode<synchronous>, transform_indices = @transform_5, window_bounds = array<i64: 32, 256>}, {pipeline_mode = #tpu.pipeline_mode<synchronous>, transform_indices = @transform_6, window_bounds = array<i64: 1, 256>}, {transform_indices = @transform_7, window_bounds = array<i64: 16, 256>}]} {
    %c0 = arith.constant 0 : index
    %c0_0 = arith.constant 0 : index
    %0 = vector.load %arg1[%c0, %c0_0] : memref<16x16xf32, #tpu.memory_space<vmem>>, vector<16x16xf32>
    %c0_1 = arith.constant 0 : index
    %c0_2 = arith.constant 0 : index
    %1 = vector.load %arg2[%c0_1, %c0_2] : memref<16x32xf32, #tpu.memory_space<vmem>>, vector<16x32xf32>
    %cst = arith.constant dense<0.000000e+00> : vector<16x32xf32>
    %2 = tpu.matmul %0, %1, %cst {dimension_numbers = #tpu.dot_dimension_numbers<[1], [0], [0], [1], [0, 0, 1, 1], [], []>} : vector<16x16xf32>, vector<16x32xf32>, vector<16x32xf32> -> vector<16x32xf32>
    %c0_3 = arith.constant 0 : index
    %c0_4 = arith.constant 0 : index
    %3 = vector.load %arg3[%c0_3, %c0_4] : memref<1x32xf32, #tpu.memory_space<vmem>>, vector<1x32xf32>
    %4 = vector.broadcast %3 : vector<1x32xf32> to vector<16x32xf32>
    %5 = arith.addf %2, %4 : vector<16x32xf32>
    %cst_5 = arith.constant 0.000000e+00 : f32
    %6 = vector.broadcast %cst_5 : f32 to vector<16x32xf32>
    %7 = arith.maximumf %5, %6 : vector<16x32xf32>
    %c0_6 = arith.constant 0 : index
    %c0_7 = arith.constant 0 : index
    %c0_8 = arith.constant 0 : index
    %8 = vector.load %arg4[%c0_6, %c0_7, %c0_8] : memref<2x32x32xf32, #tpu.memory_space<vmem>>, vector<1x32x32xf32>
    %9 = vector.shape_cast %8 : vector<1x32x32xf32> to vector<32x32xf32>
    %cst_9 = arith.constant dense<0.000000e+00> : vector<16x32xf32>
    %10 = tpu.matmul %7, %9, %cst_9 {dimension_numbers = #tpu.dot_dimension_numbers<[1], [0], [0], [1], [0, 0, 1, 1], [], []>} : vector<16x32xf32>, vector<32x32xf32>, vector<16x32xf32> -> vector<16x32xf32>
    %c0_10 = arith.constant 0 : index
    %c0_11 = arith.constant 0 : index
    %c0_12 = arith.constant 0 : index
    %11 = vector.load %arg5[%c0_10, %c0_11, %c0_12] : memref<2x1x32xf32, #tpu.memory_space<vmem>>, vector<1x1x32xf32>
    %12 = vector.shape_cast %11 : vector<1x1x32xf32> to vector<1x32xf32>
    %13 = vector.broadcast %12 : vector<1x32xf32> to vector<16x32xf32>
    %14 = arith.addf %10, %13 : vector<16x32xf32>
    %cst_13 = arith.constant 0.000000e+00 : f32
    %15 = vector.broadcast %cst_13 : f32 to vector<16x32xf32>
    %16 = arith.maximumf %14, %15 : vector<16x32xf32>
    %c1 = arith.constant 1 : index
    %c0_14 = arith.constant 0 : index
    %c0_15 = arith.constant 0 : index
    %17 = vector.load %arg4[%c1, %c0_14, %c0_15] : memref<2x32x32xf32, #tpu.memory_space<vmem>>, vector<1x32x32xf32>
    %18 = vector.shape_cast %17 : vector<1x32x32xf32> to vector<32x32xf32>
    %cst_16 = arith.constant dense<0.000000e+00> : vector<16x32xf32>
    %19 = tpu.matmul %16, %18, %cst_16 {dimension_numbers = #tpu.dot_dimension_numbers<[1], [0], [0], [1], [0, 0, 1, 1], [], []>} : vector<16x32xf32>, vector<32x32xf32>, vector<16x32xf32> -> vector<16x32xf32>
    %c1_17 = arith.constant 1 : index
    %c0_18 = arith.constant 0 : index
    %c0_19 = arith.constant 0 : index
    %20 = vector.load %arg5[%c1_17, %c0_18, %c0_19] : memref<2x1x32xf32, #tpu.memory_space<vmem>>, vector<1x1x32xf32>
    %21 = vector.shape_cast %20 : vector<1x1x32xf32> to vector<1x32xf32>
    %22 = vector.broadcast %21 : vector<1x32xf32> to vector<16x32xf32>
    %23 = arith.addf %19, %22 : vector<16x32xf32>
    %cst_20 = arith.constant 0.000000e+00 : f32
    %24 = vector.broadcast %cst_20 : f32 to vector<16x32xf32>
    %25 = arith.maximumf %23, %24 : vector<16x32xf32>
    %c0_21 = arith.constant 0 : index
    %c0_22 = arith.constant 0 : index
    %26 = vector.load %arg6[%c0_21, %c0_22] : memref<32x256xf32, #tpu.memory_space<vmem>>, vector<32x256xf32>
    %cst_23 = arith.constant dense<0.000000e+00> : vector<16x256xf32>
    %27 = tpu.matmul %25, %26, %cst_23 {dimension_numbers = #tpu.dot_dimension_numbers<[1], [0], [0], [1], [0, 0, 1, 1], [], []>} : vector<16x32xf32>, vector<32x256xf32>, vector<16x256xf32> -> vector<16x256xf32>
    %c0_24 = arith.constant 0 : index
    %c0_25 = arith.constant 0 : index
    %28 = vector.load %arg7[%c0_24, %c0_25] : memref<1x256xf32, #tpu.memory_space<vmem>>, vector<1x256xf32>
    %29 = vector.broadcast %28 : vector<1x256xf32> to vector<16x256xf32>
    %30 = arith.addf %27, %29 : vector<16x256xf32>
    %31 = math.tanh %30 : vector<16x256xf32>
    %c0_26 = arith.constant 0 : index
    %c0_27 = arith.constant 0 : index
    %32 = vector.load %arg8[%c0_26, %c0_27] : memref<16x256xf32, #tpu.memory_space<vmem>>, vector<16x256xf32>
    tpu.vector_store %arg8[%c0_26, %c0_27], %31 {strides = array<i32>} : memref<16x256xf32, #tpu.memory_space<vmem>>, vector<16x256xf32>,
    return
  }
  func.func @transform_0(%arg0: i32) -> (i32, i32) {
    %c0_i32 = arith.constant 0 : i32
    %c0_i32_0 = arith.constant 0 : i32
    return %arg0, %c0_i32 : i32, i32
  }
  func.func @transform_1(%arg0: i32) -> (i32, i32) {
    %c0_i32 = arith.constant 0 : i32
    %c0_i32_0 = arith.constant 0 : i32
    %c0_i32_1 = arith.constant 0 : i32
    return %c0_i32, %c0_i32_0 : i32, i32
  }
  func.func @transform_2(%arg0: i32) -> (i32, i32) {
    %c0_i32 = arith.constant 0 : i32
    %c0_i32_0 = arith.constant 0 : i32
    %c0_i32_1 = arith.constant 0 : i32
    return %c0_i32, %c0_i32_0 : i32, i32
  }
  func.func @transform_3(%arg0: i32) -> (i32, i32, i32) {
    %c0_i32 = arith.constant 0 : i32
    %c0_i32_0 = arith.constant 0 : i32
    %c0_i32_1 = arith.constant 0 : i32
    %c0_i32_2 = arith.constant 0 : i32
    return %c0_i32, %c0_i32_0, %c0_i32_1 : i32, i32, i32
  }
  func.func @transform_4(%arg0: i32) -> (i32, i32, i32) {
    %c0_i32 = arith.constant 0 : i32
    %c0_i32_0 = arith.constant 0 : i32
    %c0_i32_1 = arith.constant 0 : i32
    %c0_i32_2 = arith.constant 0 : i32
    return %c0_i32, %c0_i32_0, %c0_i32_1 : i32, i32, i32
  }
  func.func @transform_5(%arg0: i32) -> (i32, i32) {
    %c0_i32 = arith.constant 0 : i32
    %c0_i32_0 = arith.constant 0 : i32
    %c0_i32_1 = arith.constant 0 : i32
    return %c0_i32, %c0_i32_0 : i32, i32
  }
  func.func @transform_6(%arg0: i32) -> (i32, i32) {
    %c0_i32 = arith.constant 0 : i32
    %c0_i32_0 = arith.constant 0 : i32
    %c0_i32_1 = arith.constant 0 : i32
    return %c0_i32, %c0_i32_0 : i32, i32
  }
  func.func @transform_7(%arg0: i32) -> (i32, i32) {
    %c0_i32 = arith.constant 0 : i32
    %c0_i32_0 = arith.constant 0 : i32
    return %arg0, %c0_i32 : i32, i32
  }
}

</mosaic_0001>

<bundles_post_ra>
// kernel: tpu_custom_call.1
= control target key start
LH: loop header
LB: loop body
LE: loop exit
PB: predicated region body
PF: predicated region fallthrough
CT: control target
= control target key end

     0   :  { %12 = vsyncpa [#allocation3], 0  ;;  %s770_s0 = inlined_call_operand.hbm [shape: f32[16,16], index: 0, kind: input, shape index: {}]   ;;  %s771_s1 = inlined_call_operand.hbm [shape: f32[16,32], index: 1, kind: input, shape index: {}]   ;;  %s772_s2 = inlined_call_operand.vmem [shape: f32[1,32], index: 2, kind: input, shape index: {}]   ;;  %s773_s3 = inlined_call_operand.hbm [shape: f32[2,32,32], index: 3, kind: input, shape index: {}]   ;;  %s774_s4 = inlined_call_operand.vmem [shape: f32[2,1,32], index: 4, kind: input, shape index: {}]   ;;  %s775_s5 = inlined_call_operand.hbm [shape: f32[32,256], index: 5, kind: input, shape index: {}]   ;;  %s776_s6 = inlined_call_operand.vmem [shape: f32[1,256], index: 6, kind: input, shape index: {}]   ;;  %s777_s7 = inlined_call_operand.hbm [shape: f32[16,256], index: 7, kind: output, shape index: {}]  }
   0x1   :  { %13 = vsyncpa [#allocation6], 0 }
   0x2   :  { %14 = vsyncpa [#allocation9], 0 }
   0x3   :  { %15 = vsyncpa [#allocation4], 0  ;;  %s681_s24 = smov [#allocation5]   ;;  %s682_s26 = smov [#allocation2]  }
   0x4   :  { %s33_s25 = sshll.u32 %s681_s24, 4  ;;  %s21_s27 = sshll.u32 %s682_s26, 4  ;;  %s34_s25 = int_to_ptr.vmem [resolvable:$true] %s33_s25  ;;  %s22_s27 = int_to_ptr.vmem [resolvable:$true] %s21_s27 }
   0x5   :  { %s581_s28 = scalar_lea.vmem %s34_s25, 256  ;;  %p586_p1 = scmp.lt.s32.totalorder %s34_s25, %s34_s25 }
   0x6   :  { %p582_p0 = scmp.ne.s32.totalorder %s34_s25, %s581_s28  ;;  %p587_p2 = scmp.lt.s32.totalorder %s581_s28, %s581_s28 }
   0x8   :  { %p588_p3 = por %p587_p2, %p586_p1 }
   0xa   :  { %p589_p4 = pnand %p588_p3, %p582_p0 }
   0xc   :  { %592 = shalt.err (!%p589_p4)
}
   0xd   :  { %s683_s29 = smov 128   ;;  %s684_s30 = smov 8  }
   0xe   :  { %39 = dma.hbm_to_vmem [thread:$0]  %s771_s1, 256, %s34_s25, [#allocation6], %s683_s29, %s683_s29, %s684_s30  }
   0xf   :  { %s601_s10 = scalar_lea.vmem %s22_s27, 256  ;;  %p606_p6 = scmp.lt.s32.totalorder %s22_s27, %s22_s27 }
  0x10   :  { %p602_p5 = scmp.ne.s32.totalorder %s22_s27, %s601_s10  ;;  %p607_p7 = scmp.lt.s32.totalorder %s601_s10, %s601_s10 }
  0x12   :  { %p608_p8 = por %p607_p7, %p606_p6 }
  0x14   :  { %p609_p9 = pnand %p608_p8, %p602_p5 }
  0x16   :  { %612 = shalt.err (!%p609_p9)
}
  0x17   :  { %27 = dma.hbm_to_vmem [thread:$0]  %s770_s0, 256, %s22_s27, [#allocation3], %s683_s29, %s683_s29, %s684_s30  }
  0x18   :  { %s685_s13 = smov [#allocation7]   ;;  %s686_s15 = smov [#allocation8]  }
  0x19   :  { %s47_s14 = sshll.u32 %s685_s13, 4  ;;  %s61_s16 = sshll.u32 %s686_s15, 4  ;;  %s48_s14 = int_to_ptr.vmem [resolvable:$true] %s47_s14  ;;  %s62_s16 = int_to_ptr.vmem [resolvable:$true] %s61_s16 }
  0x1a   :  { %s621_s17 = scalar_lea.vmem %s48_s14, 1024  ;;  %p626_p11 = scmp.lt.s32.totalorder %s48_s14, %s48_s14 }
  0x1b   :  { %p622_p10 = scmp.ne.s32.totalorder %s48_s14, %s621_s17  ;;  %p627_p12 = scmp.lt.s32.totalorder %s621_s17, %s621_s17 }
  0x1d   :  { %p628_p13 = por %p627_p12, %p626_p11 }
  0x1f   :  { %p629_p0 = pnand %p628_p13, %p622_p10 }
  0x21   :  { %632 = shalt.err (!%p629_p0)
}
  0x22   :  { %53 = dma.hbm_to_vmem [thread:$0]  %s773_s3, 1024, %s48_s14, [#allocation6], %s683_s29, %s683_s29, %s684_s30  }
  0x23   :  { %s641_s19 = scalar_lea.vmem %s62_s16, 1024  ;;  %p646_p2 = scmp.lt.s32.totalorder %s62_s16, %s62_s16 }
  0x24   :  { %p642_p1 = scmp.ne.s32.totalorder %s62_s16, %s641_s19  ;;  %p647_p3 = scmp.lt.s32.totalorder %s641_s19, %s641_s19 }
  0x26   :  { %p648_p4 = por %p647_p3, %p646_p2 }
  0x28   :  { %p649_p5 = pnand %p648_p4, %p642_p1 }
  0x2a   :  { %652 = shalt.err (!%p649_p5)
}
  0x2b   :  { %s687_s0 = smov 256   ;;  %s688_s20 = smov 16  }
  0x2c   :  { %67 = dma.hbm_to_vmem [thread:$0]  %s775_s5, 1024, %s62_s16, [#allocation9], %s687_s0, %s687_s0, %s688_s20  }
  0x2d   :  { %673 = dma.done.wait [#allocation3], 256  }
  0x2e   :  { %674 = vsyncadd [#allocation3], 4294967040 }
  0x2f   :  { %675 = dma.done.wait [#allocation6], 1280  }
  0x30   :  { %676 = vsyncadd [#allocation6], 4294966016 }
  0x31   :  { %677 = dma.done.wait [#allocation9], 1024  }
  0x32   :  { %678 = vsyncadd [#allocation9], 4294966272  ;;  %vm93_vm0 = vcmask 130048   ;;  %v85_v0 = vld [vmem:[#allocation5 + $0x8] sm:$0xff]  ;;  %v84_v1 = vld [vmem:[#allocation5] sm:$0xff]  ;;  %vm188_vm1 = vcmask 261120   ;;  %v378_v42 = vlaneseq }
  0x33   :  { %v82_v2 = vld [vmem:[#allocation2] sm:$0xff]  ;;  %526 = vmatprep.subr.mxu0 %v85_v0  ;;  %v83_v3 = vld [vmem:[#allocation2 + $0x8] sm:$0xff]  ;;  %v180_v4 = vld [vmem:[#allocation7 + $0x18] sm:$0xff]  ;;  %v689_v34 = vmov 0.0  }
  0x34   :  { %530 = vmatprep.mubr.msk.f32.mxu0 %vm93_vm0, %v82_v2  ;;  %527 = vmatpush3.msra.mxu0 %v85_v0  ;;  %v179_v5 = vld [vmem:[#allocation7 + $0x10] sm:$0xff]  ;;  %v178_v6 = vld [vmem:[#allocation7 + $0x8] sm:$0xff]  ;;  %v177_v7 = vld [vmem:[#allocation7] sm:$0xff]  ;;  %v379_v43 = vshrl.u32 %v378_v42, 7 }
  0x35   :  { %528 = vmatprep.subr.mxu0 %v84_v1  ;;  %533 = vmatprep.subr.mxu1 %v180_v4  ;;  %v498_v8 = vld [vmem:[%s772_s2] ss:$0 sm:$0xff]  ;;  %v276_v15 = vld [vmem:[#allocation7 + $0x38] sm:$0xff]  ;;  %v275_v16 = vld [vmem:[#allocation7 + $0x30] sm:$0xff] }
  0x36   :  { %529 = vmatpush3.msra.mxu0 %v84_v1  ;;  %534 = vmatpush3.msra.mxu1 %v180_v4  ;;  %v274_v17 = vld [vmem:[#allocation7 + $0x28] sm:$0xff]  ;;  %v273_v18 = vld [vmem:[#allocation7 + $0x20] sm:$0xff]  ;;  %v375_v19 = vld [vmem:[#allocation8 + $0x38] sm:$0xff]  ;;  %v380_v44 = vsub.s32 0, %v379_v43  ;;  %v384_v46 = vsub.s32 1, %v379_v43 }
  0x37   :  { %531 = vmatmul.mubr.msk.f32.vlgmr.msra.gmra.mxu0 %vm93_vm0, %v83_v3  ;;  %535 = vmatprep.subr.mxu1 %v179_v5  ;;  %v501_v20 = vld [vmem:[%s774_s4] ss:$0 sm:$0xff]  ;;  %v374_v27 = vld [vmem:[#allocation8 + $0x30] sm:$0xff]  ;;  %v373_v28 = vld [vmem:[#allocation8 + $0x28] sm:$0xff] }
  0x38   :  { %536 = vmatpush3.msra.mxu1 %v179_v5  ;;  %544 = vmatprep.subr.mxu0 %v276_v15  ;;  %v372_v29 = vld [vmem:[#allocation8 + $0x20] sm:$0xff]  ;;  %v371_v30 = vld [vmem:[#allocation8 + $0x18] sm:$0xff]  ;;  %v370_v31 = vld [vmem:[#allocation8 + $0x10] sm:$0xff] }
  0x39   :  { %537 = vmatprep.subr.mxu1 %v178_v6  ;;  %545 = vmatpush3.msra.mxu0 %v276_v15  ;;  %v369_v32 = vld [vmem:[#allocation8 + $0x8] sm:$0xff]  ;;  %v368_v33 = vld [vmem:[#allocation8] sm:$0xff] }
  0x3a   :  { %538 = vmatpush3.msra.mxu1 %v178_v6  ;;  %546 = vmatprep.subr.mxu0 %v275_v16  ;;  %v505_v36 = vld [vmem:[%s774_s4 + $0x1] ss:$0 sm:$0xff]  ;;  %s690_s4 = smov [#allocation10]  }
  0x3b   :  { %539 = vmatprep.subr.mxu1 %v177_v7  ;;  %547 = vmatpush3.msra.mxu0 %v275_v16  ;;  %v376_v45 = vld [vmem:[%s776_s6] sm:$0x3]  ;;  %s484_s6 = sshll.u32 %s690_s4, 4  ;;  %s485_s6 = int_to_ptr.vmem [resolvable:$true] %s484_s6 }
  0x3c   :  { %540 = vmatpush3.msra.mxu1 %v177_v7  ;;  %548 = vmatprep.subr.mxu0 %v274_v17  ;;  %v381_v47 = vrot.slane %v376_v45, %v380_v44  ;;  %v385_v48 = vrot.slane %v376_v45, %v384_v46  ;;  %s653_s28 = scalar_lea.vmem %s485_s6, 512  ;;  %p658_p7 = scmp.lt.s32.totalorder %s485_s6, %s485_s6 }
  0x3d   :  { %549 = vmatpush3.msra.mxu0 %v274_v17  ;;  %418 = vmatprep.subr.mxu1 %v375_v19  ;;  %p654_p6 = scmp.ne.s32.totalorder %s485_s6, %s653_s28  ;;  %p659_p8 = scmp.lt.s32.totalorder %s653_s28, %s653_s28 }
  0x3e   :  { %550 = vmatprep.subr.mxu0 %v273_v18 }
  0x3f   :  { %551 = vmatpush3.msra.mxu0 %v273_v18  ;;  %p660_p9 = por %p659_p8, %p658_p7 }
  0x41   :  { %p661_p10 = pnand %p660_p9, %p654_p6 }
  0xf7   :  { %v532_v9 = vpop.f32.mrf.mxu0 }
  0xf8   :  { %v172_v10 = vadd.f32 %v532_v9, %v498_v8 }
  0xf9   :  { %v166_v11 = vpop.f32.mrf.mxu0 }
  0xfa   :  { %v167_v12 = vadd.f32 %v498_v8, %v166_v11  ;;  %v176_v14 = vmax.f32 %v172_v10, 0.0 }
  0xfc   :  { %v175_v13 = vmax.f32 %v167_v12, 0.0 }
  0xfe   :  { %541 = vmatprep.mubr.msk.f32.mxu1 %vm188_vm1, %v175_v13 }
  0xff   :  { %542 = vmatmul.mubr.msk.f32.vlgmr.msra.gmra.mxu1 %vm188_vm1, %v176_v14 }
 0x100   :  { %419 = vmatpush1.msra.mxu1 %v374_v27  ;;  %458 = vmatprep.mubr.f32.mxu1 %v689_v34 }
 0x101   :  { %420 = vmatprep.subr.mxu1 %v373_v28 }
 0x102   :  { %421 = vmatpush1.msra.mxu1 %v372_v29 }
 0x103   :  { %422 = vmatprep.subr.mxu1 %v371_v30 }
 0x104   :  { %423 = vmatpush1.msra.mxu1 %v370_v31 }
 0x105   :  { %424 = vmatprep.subr.mxu1 %v369_v32 }
 0x106   :  { %425 = vmatpush1.msra.mxu1 %v368_v33 }
 0x1bf   :  { %v543_v21 = vpop.f32.mrf.mxu1 }
 0x1c0   :  { %v267_v22 = vadd.f32 %v543_v21, %v501_v20 }
 0x1c1   :  { %v261_v23 = vpop.f32.mrf.mxu1 }
 0x1c2   :  { %v262_v24 = vadd.f32 %v501_v20, %v261_v23  ;;  %v271_v26 = vmax.f32 %v267_v22, 0.0 }
 0x1c4   :  { %v270_v25 = vmax.f32 %v262_v24, 0.0 }
 0x1c6   :  { %552 = vmatprep.mubr.msk.f32.mxu0 %vm188_vm1, %v270_v25 }
 0x1c7   :  { %553 = vmatmul.mubr.msk.f32.vlgmr.msra.gmra.mxu0 %vm188_vm1, %v271_v26 }
 0x287   :  { %v554_v35 = vpop.f32.mrf.mxu0 }
 0x288   :  { %v363_v39 = vadd.f32 %v554_v35, %v505_v36 }
 0x289   :  { %v357_v37 = vpop.f32.mrf.mxu0 }
 0x28a   :  { %v358_v38 = vadd.f32 %v505_v36, %v357_v37  ;;  %v367_v41 = vmax.f32 %v363_v39, 0.0 }
 0x28c   :  { %v366_v40 = vmax.f32 %v358_v38, 0.0 }
 0x28e   :  { %508 = vmatmul.mubr.msk.f32.vlgmr.msra.gmra.mxu1 %vm188_vm1, %v366_v40 }
 0x28f   :  { %464 = vmatprep.mubr.f32.mxu1 %v689_v34 }
 0x292   :  { %509 = vmatmul.mubr.msk.f32.gmra.mxu1 %vm188_vm1, %v367_v41 }
 0x34e   :  { %v460_v49 = vpop.f32.mrf.mxu1 }
 0x34f   :  { %v461_v50 = vadd.f32 %v460_v49, %v381_v47 }
 0x350   :  { %v462_v51 = vpop.f32.mrf.mxu1 }
 0x351   :  { %565 = vtanh.f32 %v461_v50  ;;  %v463_v52 = vadd.f32 %v462_v51, %v385_v48 }
 0x352   :  { %v466_v53 = vpop.f32.mrf.mxu1 }
 0x353   :  { %567 = vtanh.f32 %v463_v52  ;;  %v467_v54 = vadd.f32 %v466_v53, %v381_v47 }
 0x354   :  { %v468_v55 = vpop.f32.mrf.mxu1 }
 0x355   :  { %569 = vtanh.f32 %v467_v54  ;;  %v469_v56 = vadd.f32 %v468_v55, %v385_v48 }
 0x357   :  { %571 = vtanh.f32 %v469_v56 }
 0x35e   :  { %v566_v57 = vpop.eup %565 }
 0x35f   :  { %475 = vst [vmem:[#allocation10] sm:$0xff] %v566_v57 }
 0x360   :  { %v568_v58 = vpop.eup %567 }
 0x361   :  { %476 = vst [vmem:[#allocation10 + $0x8] sm:$0xff] %v568_v58 }
 0x362   :  { %v570_v59 = vpop.eup %569 }
 0x363   :  { %477 = vst [vmem:[#allocation10 + $0x10] sm:$0xff] %v570_v59 }
 0x364   :  { %v572_v60 = vpop.eup %571 }
 0x365   :  { %478 = vst [vmem:[#allocation10 + $0x18] sm:$0xff] %v572_v60 }
 0x366   :  { %664 = shalt.err (!%p661_p10)
}
 0x367   :  { %490 = dma.vmem_to_hbm [thread:$0]  %s485_s6, 512, %s777_s7, [#allocation4], %s687_s0, %s687_s0, %s688_s20  }
 0x368   :  { %679 = dma.done.wait [#allocation4], 512  }
 0x369   :  { %680 = vsyncadd [#allocation4], 4294966784 }
 0x36a   :  { %494 = vsyncpa [#allocation3], 1 }
 0x36b   :  { %495 = vsyncpa [#allocation6], 1 }
 0x36c   :  { %496 = vsyncpa [#allocation9], 1 }
 0x36d   :  { %497 = vsyncpa [#allocation4], 1 }

</bundles_post_ra>
